<compile_context>
chip_gen: v7x
topology: tpu7x:2x2x1
jax: 0.10.0
libtpu: 0.0.40
codegen_flags: <defaults>
</compile_context>

<pallas_src>
import functools
import math

import jax
import jax.numpy as jnp
from jax.experimental import pallas as pl
from jax.experimental.pallas import tpu as pltpu


# ---------------------------------------------------------------------------
# Single-pass fused kernel: stats + normalize on a whole folded sample.
# ---------------------------------------------------------------------------
def _fused_kernel(x_ref, wb_ref, out_ref, mean_ref, std_ref, *, inv_n, eps):
    x = x_ref[0].astype(jnp.float32)                           # (Cs, L)
    mean = jnp.sum(x, axis=(0, 1), keepdims=True) * inv_n      # (1, 1)
    d = x - mean
    var = jnp.sum(d * d, axis=(0, 1), keepdims=True) * inv_n   # exact, centered
    std = jnp.sqrt(var + eps)
    inv = 1.0 / std
    w = wb_ref[:, 0:1]                                         # (Cs, 1)
    b = wb_ref[:, 1:2]
    out_ref[0] = (d * (w * inv) + b).astype(out_ref.dtype)
    mean_ref[0] = mean
    std_ref[0] = std


# ---------------------------------------------------------------------------
# Two-pass path, pass 1: per-sample stats with elementwise accumulators.
# ---------------------------------------------------------------------------
def _stats_kernel(x_ref, wb_ref, mean_ref, std_ref, scale_ref, shift_ref,
                  sum_acc, sq_acc, *, L, inv_n, eps):
    t = pl.program_id(1)
    _, Cs, tile = x_ref.shape

    x = x_ref[0].astype(jnp.float32)                           # (Cs, tile)
    # Mask lanes past the true extent (ragged last-tile reads are undefined).
    rem = L - t * tile
    lane = jax.lax.broadcasted_iota(jnp.int32, (Cs, tile), 1)
    x = jnp.where(lane < rem, x, 0.0)

    @pl.when(t == 0)
    def _():
        sum_acc[...] = jnp.zeros_like(sum_acc)
        sq_acc[...] = jnp.zeros_like(sq_acc)

    # Elementwise (VALU-only) accumulation; cross-lane reduce once per sample.
    sum_acc[...] += x
    sq_acc[...] += x * x

    @pl.when(t == pl.num_programs(1) - 1)
    def _():
        total = jnp.sum(sum_acc[...], axis=(0, 1), keepdims=True)   # (1, 1)
        sqtot = jnp.sum(sq_acc[...], axis=(0, 1), keepdims=True)
        mean = total * inv_n
        var = jnp.maximum(sqtot * inv_n - mean * mean, 0.0)         # cancellation guard
        std = jnp.sqrt(var + eps)
        inv = 1.0 / std
        w = wb_ref[:, 0:1]                                          # (Cs, 1)
        b = wb_ref[:, 1:2]
        scale = w * inv                                             # (Cs, 1)
        shift = b - mean * scale
        mean_ref[0] = mean
        std_ref[0] = std
        scale_ref[0] = scale
        shift_ref[0] = shift


# ---------------------------------------------------------------------------
# Two-pass path, pass 2: fused FMA per element (out = x*scale + shift).
# ---------------------------------------------------------------------------
def _normalize_kernel(x_ref, scale_ref, shift_ref, out_ref):
    x = x_ref[0].astype(jnp.float32)                           # (Cs, tile)
    out_ref[0] = (x * scale_ref[0] + shift_ref[0]).astype(out_ref.dtype)


# ---------------------------------------------------------------------------
# Layout helpers.
# ---------------------------------------------------------------------------
def _fold_factor(C, H):
    """Smallest Hs dividing H with C*Hs a multiple of 8 (else 1)."""
    need = 8 // math.gcd(C, 8)
    for hs in range(need, H + 1, need):
        if H % hs == 0:
            return hs
    return 1


def _lane_tile(Cs, L, itemsize, target_block_bytes):
    """Lane tile: multiple of 128 (~target_block_bytes blocks) or the full L."""
    max_lanes = max(128, (target_block_bytes // (Cs * itemsize)) // 128 * 128)
    return L if L <= max_lanes else max_lanes


# ---------------------------------------------------------------------------
# Forward wrapper.
# ---------------------------------------------------------------------------
def rln_forward(x, weight, bias, meta1_w, meta1_b, meta2_w, meta2_b, eps=1e-5,
                *, force_two_pass=False, lane_tile_bytes=2 << 20,
                single_pass_max_bytes=4 << 20):
    """x: (B, C, H, W). Returns (out (B,C,H,W), rescale (B,C,1,1), rebias (B,C,1,1))."""
    B, C, H, W = x.shape
    n = C * H * W

    # Fold rows of H into the channel/sublane axis (C=4 -> 8 sublanes here).
    Hs = _fold_factor(C, H)
    Cs = C * Hs
    L = (H // Hs) * W
    x_f = x.reshape(B, Cs, L)        # contiguous regrouping: free reshape, no pad

    # Folded per-channel weight / bias, packed as a single (Cs, 2) f32 array.
    w_f = jnp.repeat(weight.reshape(C).astype(jnp.float32), Hs)
    b_f = jnp.repeat(bias.reshape(C).astype(jnp.float32), Hs)
    wb = jnp.stack([w_f, b_f], axis=1)                          # (Cs, 2)

    sample_f32_bytes = Cs * L * 4
    single_pass = (not force_two_pass) and sample_f32_bytes <= single_pass_max_bytes

    if single_pass:
        # 2 HBM passes (read + write); 4-MiB samples keep 2in+2out buffers +
        # temps well under the 48 MiB scoped limit (safe even on v7x's 64 MiB).
        out_f, mean_b, std_b = pl.pallas_call(
            functools.partial(_fused_kernel, inv_n=1.0 / n, eps=float(eps)),
            out_shape=(jax.ShapeDtypeStruct((B, Cs, L), x.dtype),
                       jax.ShapeDtypeStruct((B, 1, 1), jnp.float32),
                       jax.ShapeDtypeStruct((B, 1, 1), jnp.float32)),
            grid_spec=pltpu.PrefetchScalarGridSpec(
                num_scalar_prefetch=0,
                grid=(B,),
                in_specs=[pl.BlockSpec((1, Cs, L), lambda b: (b, 0, 0)),
                          pl.BlockSpec((Cs, 2), lambda b: (0, 0))],
                out_specs=[pl.BlockSpec((1, Cs, L), lambda b: (b, 0, 0)),
                           pl.BlockSpec((1, 1, 1), lambda b: (b, 0, 0)),
                           pl.BlockSpec((1, 1, 1), lambda b: (b, 0, 0))]),
            compiler_params=pltpu.CompilerParams(
                dimension_semantics=("parallel",),
                vmem_limit_bytes=48 << 20),
        )(x_f, wb)
    else:
        tile = _lane_tile(Cs, L, jnp.dtype(x.dtype).itemsize, lane_tile_bytes)
        nt = pl.cdiv(L, tile)                       # ragged last tile handled in-kernel

        # ---------------- pass 1: per-sample stats + scale/shift ----------------
        mean_b, std_b, scale, shift = pl.pallas_call(
            functools.partial(_stats_kernel, L=L, inv_n=1.0 / n, eps=float(eps)),
            out_shape=(jax.ShapeDtypeStruct((B, 1, 1), jnp.float32),
                       jax.ShapeDtypeStruct((B, 1, 1), jnp.float32),
                       jax.ShapeDtypeStruct((B, Cs, 1), jnp.float32),
                       jax.ShapeDtypeStruct((B, Cs, 1), jnp.float32)),
            grid_spec=pltpu.PrefetchScalarGridSpec(
                num_scalar_prefetch=0,
                grid=(B, nt),
                in_specs=[pl.BlockSpec((1, Cs, tile), lambda b, t: (b, 0, t)),
                          pl.BlockSpec((Cs, 2), lambda b, t: (0, 0))],
                out_specs=[pl.BlockSpec((1, 1, 1), lambda b, t: (b, 0, 0)),
                           pl.BlockSpec((1, 1, 1), lambda b, t: (b, 0, 0)),
                           pl.BlockSpec((1, Cs, 1), lambda b, t: (b, 0, 0)),
                           pl.BlockSpec((1, Cs, 1), lambda b, t: (b, 0, 0))],
                scratch_shapes=[pltpu.VMEM((Cs, tile), jnp.float32),
                                pltpu.VMEM((Cs, tile), jnp.float32)]),
            compiler_params=pltpu.CompilerParams(
                dimension_semantics=("parallel", "arbitrary"),
                vmem_limit_bytes=32 << 20),
        )(x_f, wb)
        # NOTE(v7x): for B == 1 the stats pass leaves one TensorCore idle; a
        # per-core partial-sum split of the lane-tile axis would recover ~2x there.

        # ---------------- pass 2: normalize + affine (fused FMA) ----------------
        out_f = pl.pallas_call(
            _normalize_kernel,
            out_shape=jax.ShapeDtypeStruct((B, Cs, L), x.dtype),
            grid_spec=pltpu.PrefetchScalarGridSpec(
                num_scalar_prefetch=0,
                grid=(B, nt),
                in_specs=[pl.BlockSpec((1, Cs, tile), lambda b, t: (b, 0, t)),
                          pl.BlockSpec((1, Cs, 1), lambda b, t: (b, 0, 0)),
                          pl.BlockSpec((1, Cs, 1), lambda b, t: (b, 0, 0))],
                out_specs=pl.BlockSpec((1, Cs, tile), lambda b, t: (b, 0, t))),
            compiler_params=pltpu.CompilerParams(
                dimension_semantics=("parallel", "parallel"),
                vmem_limit_bytes=32 << 20),
        )(x_f, scale, shift)

    # rescale / rebias: 1x1 conv (1 -> C) on the per-sample scalars (tiny XLA math).
    m1w = meta1_w.reshape(1, C).astype(jnp.float32)
    m1b = meta1_b.reshape(1, C).astype(jnp.float32)
    m2w = meta2_w.reshape(1, C).astype(jnp.float32)
    m2b = meta2_b.reshape(1, C).astype(jnp.float32)
    std2 = std_b.reshape(B, 1)
    mean2 = mean_b.reshape(B, 1)
    rescale = (std2 * m1w + m1b).reshape(B, C, 1, 1).astype(x.dtype)
    rebias = (mean2 * m2w + m2b).reshape(B, C, 1, 1).astype(x.dtype)

    out = out_f.reshape(B, C, H, W)
    return out, rescale, rebias


def rln_reference(x, weight, bias, meta1_w, meta1_b, meta2_w, meta2_b, eps=1e-5):
    """Pure-JAX reference matching the PyTorch forward exactly."""
    mean = jnp.mean(x, axis=(1, 2, 3), keepdims=True)
    std = jnp.sqrt(jnp.mean((x - mean) ** 2, axis=(1, 2, 3), keepdims=True) + eps)
    normalized = (x - mean) / std
    out = normalized * weight + bias
    C = weight.shape[1]
    rescale = std * meta1_w.reshape(1, C, 1, 1) + meta1_b.reshape(1, C, 1, 1)
    rebias = mean * meta2_w.reshape(1, C, 1, 1) + meta2_b.reshape(1, C, 1, 1)
    return out, rescale, rebias


if __name__ == "__main__":
    eps = 1e-5
    key = jax.random.PRNGKey(0)
    kx, k1, k2, kx2 = jax.random.split(key, 4)

    B, C, H, W = 2, 4, 16, 16
    x = jax.random.normal(kx, (B, C, H, W), dtype=jnp.float32)

    # Deterministic parameter init mirroring the PyTorch __init__:
    weight = jnp.ones((1, C, 1, 1), dtype=jnp.float32)            # nn.Parameter(ones)
    bias = jnp.zeros((1, C, 1, 1), dtype=jnp.float32)             # nn.Parameter(zeros)
    meta1_w = 0.02 * jax.random.truncated_normal(k1, -2.0, 2.0, (C, 1, 1, 1), jnp.float32)
    meta1_b = jnp.ones((C,), dtype=jnp.float32)                   # constant_(bias, 1)
    meta2_w = 0.02 * jax.random.truncated_normal(k2, -2.0, 2.0, (C, 1, 1, 1), jnp.float32)
    meta2_b = jnp.zeros((C,), dtype=jnp.float32)                  # constant_(bias, 0)

    # --- Path 1: single-pass fused kernel (sample fits in VMEM) ---
    out, rescale, rebias = rln_forward(
        x, weight, bias, meta1_w, meta1_b, meta2_w, meta2_b, eps=eps)
    jax.block_until_ready((out, rescale, rebias))
    out_ref, rescale_ref, rebias_ref = rln_reference(
        x, weight, bias, meta1_w, meta1_b, meta2_w, meta2_b, eps=eps)
    assert out.shape == (B, C, H, W)
    assert rescale.shape == (B, C, 1, 1)
    assert rebias.shape == (B, C, 1, 1)
    assert jnp.allclose(out, out_ref, atol=1e-5, rtol=1e-5)
    assert jnp.allclose(rescale, rescale_ref, atol=1e-6, rtol=1e-5)
    assert jnp.allclose(rebias, rebias_ref, atol=1e-6, rtol=1e-5)

    # --- Path 2: two-pass tiled kernels with a ragged last lane tile ---
    H2, W2 = 16, 20                         # folded L = 160 -> tiles of 128 + ragged 32
    x2 = jax.random.normal(kx2, (B, C, H2, W2), dtype=jnp.float32)
    out2, rescale2, rebias2 = rln_forward(
        x2, weight, bias, meta1_w, meta1_b, meta2_w, meta2_b, eps=eps,
        force_two_pass=True, lane_tile_bytes=4096)
    jax.block_until_ready((out2, rescale2, rebias2))
    out2_ref, rescale2_ref, rebias2_ref = rln_reference(
        x2, weight, bias, meta1_w, meta1_b, meta2_w, meta2_b, eps=eps)
    assert out2.shape == (B, C, H2, W2)
    assert jnp.allclose(out2, out2_ref, atol=1e-5, rtol=1e-5)
    assert jnp.allclose(rescale2, rescale2_ref, atol=1e-6, rtol=1e-5)
    assert jnp.allclose(rebias2, rebias2_ref, atol=1e-6, rtol=1e-5)

    print("KERNEL_OK")
</pallas_src>

<mosaic_0001>
module attributes {stable_mosaic.version = 11 : i64} {
  func.func @_fused_kernel(%arg0: i32, %arg1: memref<1x8x128xf32, #tpu.memory_space<vmem>>, %arg2: memref<8x2xf32, #tpu.memory_space<vmem>>, %arg3: memref<1x8x128xf32, #tpu.memory_space<vmem>>, %arg4: memref<1x1x1xf32, #tpu.memory_space<vmem>>, %arg5: memref<1x1x1xf32, #tpu.memory_space<vmem>>) attributes {dimension_semantics = [#tpu.dimension_semantics<parallel>], iteration_bounds = array<i64: 2>, scalar_prefetch = 0 : i64, scratch_operands = 0 : i64, tpu.core_type = #tpu.core_type<tc>, window_params = [{transform_indices = @transform_0, window_bounds = array<i64: 1, 8, 128>}, {pipeline_mode = #tpu.pipeline_mode<synchronous>, transform_indices = @transform_1, window_bounds = array<i64: 8, 2>}, {transform_indices = @transform_2, window_bounds = array<i64: 1, 8, 128>}, {transform_indices = @transform_3, window_bounds = array<i64: 1, 1, 1>}, {transform_indices = @transform_4, window_bounds = array<i64: 1, 1, 1>}]} {
    %c0 = arith.constant 0 : index
    %c0_0 = arith.constant 0 : index
    %c0_1 = arith.constant 0 : index
    %0 = vector.load %arg1[%c0, %c0_0, %c0_1] : memref<1x8x128xf32, #tpu.memory_space<vmem>>, vector<1x8x128xf32>
    %1 = vector.shape_cast %0 : vector<1x8x128xf32> to vector<8x128xf32>
    %2 = vector.shape_cast %1 : vector<8x128xf32> to vector<1x8x128xf32>
    %cst = arith.constant dense<0.000000e+00> : vector<1xf32>
    %3 = vector.multi_reduction <add>, %2, %cst [1, 2] : vector<1x8x128xf32> to vector<1xf32>
    %4 = vector.shape_cast %3 : vector<1xf32> to vector<1x1x1xf32>
    %5 = vector.extract %4[0, 0, 0] : f32 from vector<1x1x1xf32>
    %6 = vector.broadcast %5 : f32 to vector<1x1xf32>
    %cst_2 = arith.constant 9.765625E-4 : f32
    %7 = vector.broadcast %cst_2 : f32 to vector<1x1xf32>
    %8 = arith.mulf %6, %7 : vector<1x1xf32>
    %9 = vector.broadcast %8 : vector<1x1xf32> to vector<8x128xf32>
    %10 = arith.subf %1, %9 : vector<8x128xf32>
    %11 = arith.mulf %10, %10 : vector<8x128xf32>
    %12 = vector.shape_cast %11 : vector<8x128xf32> to vector<1x8x128xf32>
    %cst_3 = arith.constant dense<0.000000e+00> : vector<1xf32>
    %13 = vector.multi_reduction <add>, %12, %cst_3 [1, 2] : vector<1x8x128xf32> to vector<1xf32>
    %14 = vector.shape_cast %13 : vector<1xf32> to vector<1x1x1xf32>
    %15 = vector.extract %14[0, 0, 0] : f32 from vector<1x1x1xf32>
    %16 = vector.broadcast %15 : f32 to vector<1x1xf32>
    %cst_4 = arith.constant 9.765625E-4 : f32
    %17 = vector.broadcast %cst_4 : f32 to vector<1x1xf32>
    %18 = arith.mulf %16, %17 : vector<1x1xf32>
    %cst_5 = arith.constant 9.99999974E-6 : f32
    %19 = vector.broadcast %cst_5 : f32 to vector<1x1xf32>
    %20 = arith.addf %18, %19 : vector<1x1xf32>
    %21 = math.sqrt %20 : vector<1x1xf32>
    %cst_6 = arith.constant 1.000000e+00 : f32
    %22 = vector.broadcast %cst_6 : f32 to vector<1x1xf32>
    %23 = arith.divf %22, %21 : vector<1x1xf32>
    %c0_7 = arith.constant 0 : index
    %c0_8 = arith.constant 0 : index
    %24 = vector.load %arg2[%c0_7, %c0_8] : memref<8x2xf32, #tpu.memory_space<vmem>>, vector<8x1xf32>
    %c0_9 = arith.constant 0 : index
    %c1 = arith.constant 1 : index
    %25 = vector.load %arg2[%c0_9, %c1] : memref<8x2xf32, #tpu.memory_space<vmem>>, vector<8x1xf32>
    %26 = vector.broadcast %23 : vector<1x1xf32> to vector<8x1xf32>
    %27 = arith.mulf %24, %26 : vector<8x1xf32>
    %28 = vector.broadcast %27 : vector<8x1xf32> to vector<8x128xf32>
    %29 = arith.mulf %10, %28 : vector<8x128xf32>
    %30 = vector.broadcast %25 : vector<8x1xf32> to vector<8x128xf32>
    %31 = arith.addf %29, %30 : vector<8x128xf32>
    %c0_10 = arith.constant 0 : index
    %c0_11 = arith.constant 0 : index
    %c0_12 = arith.constant 0 : index
    %32 = vector.load %arg3[%c0_10, %c0_11, %c0_12] : memref<1x8x128xf32, #tpu.memory_space<vmem>>, vector<1x8x128xf32>
    %33 = vector.shape_cast %32 : vector<1x8x128xf32> to vector<8x128xf32>
    %34 = vector.shape_cast %31 : vector<8x128xf32> to vector<1x8x128xf32>
    tpu.vector_store %arg3[%c0_10, %c0_11, %c0_12], %34 {strides = array<i32>} : memref<1x8x128xf32, #tpu.memory_space<vmem>>, vector<1x8x128xf32>,
    %c0_13 = arith.constant 0 : index
    %c0_14 = arith.constant 0 : index
    %c0_15 = arith.constant 0 : index
    %35 = vector.load %arg4[%c0_13, %c0_14, %c0_15] : memref<1x1x1xf32, #tpu.memory_space<vmem>>, vector<1x1x1xf32>
    %36 = vector.shape_cast %35 : vector<1x1x1xf32> to vector<1x1xf32>
    %37 = vector.shape_cast %8 : vector<1x1xf32> to vector<1x1x1xf32>
    tpu.vector_store %arg4[%c0_13, %c0_14, %c0_15], %37 {strides = array<i32>} : memref<1x1x1xf32, #tpu.memory_space<vmem>>, vector<1x1x1xf32>,
    %c0_16 = arith.constant 0 : index
    %c0_17 = arith.constant 0 : index
    %c0_18 = arith.constant 0 : index
    %38 = vector.load %arg5[%c0_16, %c0_17, %c0_18] : memref<1x1x1xf32, #tpu.memory_space<vmem>>, vector<1x1x1xf32>
    %39 = vector.shape_cast %38 : vector<1x1x1xf32> to vector<1x1xf32>
    %40 = vector.shape_cast %21 : vector<1x1xf32> to vector<1x1x1xf32>
    tpu.vector_store %arg5[%c0_16, %c0_17, %c0_18], %40 {strides = array<i32>} : memref<1x1x1xf32, #tpu.memory_space<vmem>>, vector<1x1x1xf32>,
    return
  }
  func.func @transform_0(%arg0: i32) -> (i32, i32, i32) {
    %c0_i32 = arith.constant 0 : i32
    %c0_i32_0 = arith.constant 0 : i32
    %c0_i32_1 = arith.constant 0 : i32
    return %arg0, %c0_i32, %c0_i32_0 : i32, i32, i32
  }
  func.func @transform_1(%arg0: i32) -> (i32, i32) {
    %c0_i32 = arith.constant 0 : i32
    %c0_i32_0 = arith.constant 0 : i32
    %c0_i32_1 = arith.constant 0 : i32
    return %c0_i32, %c0_i32_0 : i32, i32
  }
  func.func @transform_2(%arg0: i32) -> (i32, i32, i32) {
    %c0_i32 = arith.constant 0 : i32
    %c0_i32_0 = arith.constant 0 : i32
    %c0_i32_1 = arith.constant 0 : i32
    return %arg0, %c0_i32, %c0_i32_0 : i32, i32, i32
  }
  func.func @transform_3(%arg0: i32) -> (i32, i32, i32) {
    %c0_i32 = arith.constant 0 : i32
    %c0_i32_0 = arith.constant 0 : i32
    %c0_i32_1 = arith.constant 0 : i32
    return %arg0, %c0_i32, %c0_i32_0 : i32, i32, i32
  }
  func.func @transform_4(%arg0: i32) -> (i32, i32, i32) {
    %c0_i32 = arith.constant 0 : i32
    %c0_i32_0 = arith.constant 0 : i32
    %c0_i32_1 = arith.constant 0 : i32
    return %arg0, %c0_i32, %c0_i32_0 : i32, i32, i32
  }
}

</mosaic_0001>

<bundles_post_ra>
// kernel: tpu_custom_call.1
= control target key start
LH: loop header
LB: loop body
LE: loop exit
PB: predicated region body
PF: predicated region fallthrough
CT: control target
= control target key end

     0   :  { %10 = vsyncpa [#allocation3], 0  ;;  %s797_s0 = inlined_call_operand.hbm [shape: f32[2,8,128], index: 0, kind: input, shape index: {}]   ;;  %s798_s1 = inlined_call_operand.vmem [shape: f32[8,2], index: 1, kind: input, shape index: {}]   ;;  %s799_s2 = inlined_call_operand.hbm [shape: f32[2,8,128], index: 2, kind: output, shape index: {0}]   ;;  %s800_s3 = inlined_call_operand.vmem [shape: f32[2,1,1], index: 3, kind: output, shape index: {1}]   ;;  %s801_s4 = inlined_call_operand.vmem [shape: f32[2,1,1], index: 4, kind: output, shape index: {2}]  }
   0x1   :  { %12 = vsyncpa [#allocation3 + $0x1], 0 }
   0x2   :  { %13 = vsyncpa [#allocation4], 0 }
   0x3   :  { %15 = vsyncpa [#allocation4 + $0x1], 0  ;;  %s615_s15 = smov 0   ;;  %s617_s16 = smov 0  }
   0x4   :  { %s619_s17 = smov 0   ;;  %s621_s18 = smov 0  }
   0x5 LB: > { %s636_s19 = sadd.s32 4294967295, %s584_s18   ;;  %s417_s20 = sadd.s32 4294967294, %s584_s18   ;;  %s584_s18 = sphi %s621_s18, %s816_s18   ;;  %s580_s17 = sphi %s619_s17, %s815_s17   ;;  %s576_s16 = sphi %s617_s16, %s814_s16   ;;  %s572_s15 = sphi %s615_s15, %s813_s15  }
   0x6   : > { %s640_s21 = sadd.s32 1, %s584_s18   ;;  %s28_s22 = sadd.s32 1, %s580_s17 }
   0x7   : > { %s25_s23 = ssub.s32 %s584_s18, %s640_s21  ;;  %p35_p0 = scmp.ne.s32.totalorder %s580_s17, %s576_s16 }
   0x8   : > { %p26_p1 = scmp.eq.s32.totalorder %s25_s23, 0  ;;  %p36_p2 = scmp.eq.s32.totalorder %s584_s18, 0 }
   0x9   : > { %p41_p3 = scmp.ne.s32.totalorder %s576_s16, %s572_s15  ;;  %p42_p4 = scmp.eq.s32.totalorder %s636_s19, 0 }
   0xa   : > { %s652_s24 = scalar_select %p26_p1, %s580_s17, %s28_s22  }
   0xb   : > { %p654_p5 = por %p36_p2, %p35_p0  ;;  %p658_p6 = por %p42_p4, %p41_p3 }
   0xc   : > { %p86_p7 = scmp.eq.s32.totalorder %s636_s19, 1  ;;  %p92_p8 = scmp.eq.s32.totalorder %s417_s20, 1 }
   0xd   : > { %p445_p10 = scmp.lt.s32.totalorder %s584_s18, 2  ;;  %s167_s29 = sand.u32 1, %s580_s17  }
   0xe   : > { %p665_p11 = por %p86_p7, %p35_p0  ;;  %p669_p12 = por %p92_p8, %p41_p3 }
   0xf   : > { %s421_s30 = sshll.u32 %s584_s18, 7  ;;  %s420_s5 = sshll.u32 %s167_s29, 3 }
  0x10   : > { %s805_s27 = scalar_select %p665_p11, 1, 0 }
  0x11   : > { %s806_s28 = scalar_select %p669_p12, 1, 0 }
  0x12   : > { %s678_s8 = scalar_lea.hbm %s797_s0, %s421_s30  ;;  %s171_s9 = scalar_lea.vmem [#allocation2], %s420_s5 }
  0x13   : > { %s178_s10 = sshll.u32 %s171_s9, 4  ;;  %p682_p13 = pnand %p445_p10, %p654_p5  ;;  %s686_s10 = int_to_ptr.vmem [resolvable:$true] %s178_s10 }
  0x14   : > { %s168_s12 = scalar_lea.sflag [#allocation3], %s167_s29  ;;  %s488_s13 = scalar_lea.hbm %s678_s8, 128 }
  0x15   : > { %p489_p2 = scmp.ne.s32.totalorder %s678_s8, %s488_s13  ;;  %p490_p3 = pneg %p682_p13 }
  0x16   : > { %s493_s22 = scalar_lea.hbm %s797_s0, 256  ;;  %p494_p5 = scmp.lt.u32.totalorder %s678_s8, %s797_s0 }
  0x17   : > { %p491_p4 = pnand %p490_p3, %p489_p2  ;;  %p495_p8 = scmp.lt.u32.totalorder %s493_s22, %s488_s13 }
  0x18   : > { %p497_p9 = scmp.lt.u32.totalorder %s488_s13, %s678_s8 }
  0x19   : > { %p492_p7 = pneg %p491_p4  ;;  %p496_p10 = por %p495_p8, %p494_p5 }
  0x1b   : > { %p498_p0 = por %p497_p9, %p496_p10 }
  0x1d   : > { %p499_p1 = pnand %p498_p0, %p492_p7 }
  0x1f   : > { %502 = shalt.err (!%p499_p1)
}
  0x20   : > { %s503_s29 = scalar_lea.vmem %s686_s10, 128  ;;  %s586_s30 = smov [#allocation2]  }
  0x21   : > { %p504_p2 = scmp.ne.s32.totalorder %s686_s10, %s503_s29  ;;  %s508_s5 = sshll.u32 %s586_s30, 4  ;;  %s509_s5 = int_to_ptr.vmem [resolvable:$false] %s508_s5 }
  0x22   : > { %s510_s6 = scalar_lea.vmem %s509_s5, 256  ;;  %p511_p11 = scmp.lt.s32.totalorder %s686_s10, %s509_s5 }
  0x23   : > { %p506_p4 = pnand %p504_p2, %p490_p3  ;;  %p512_p5 = scmp.lt.s32.totalorder %s510_s6, %s503_s29 }
  0x25   : > { %p507_p12 = pneg %p506_p4  ;;  %p513_p8 = por %p512_p5, %p511_p11 }
  0x27   : > { %p514_p9 = pnand %p513_p8, %p507_p12 }
  0x29   : > { %517 = shalt.err (!%p514_p9)
}
  0x2a   : > { %440 = dma.hbm_to_vmem [thread:$0]  (!%p682_p13), %s678_s8, 128, %s686_s10, %s168_s12  }
  0x2b   : > { %p808_p0 = scmp.lt.s32.totalorder %s584_s18, 3  ;;  %p809_p1 = scmp.ge.s32.totalorder %s584_s18, 1 }
  0x2d   : > { %p184_p3 = pnand %p809_p1, %p808_p0 }
  0x2e   : > { %s720_s7 = sand.u32 (!%p184_p3), 1, %s576_s16  }
  0x2f   : > { %187 = sbr.rel (%p184_p3) target bundleno = 653 (0x28d), region = 28  ;;  %s423_s9 = sshll.u32 (!%p184_p3), %s720_s7, 3 }
  0x30   : > { %s190_s13 = scalar_lea.sflag (!%p184_p3), [#allocation3], %s720_s7  ;;  %s193_s11 = scalar_lea.vmem (!%p184_p3), [#allocation2], %s423_s9 }
  0x36   : > { %563 = dma.done.wait (%p658_p6), %s190_s13, 128  }
  0x37   : > { %565 = vsyncadd (%p658_p6), %s190_s13, 4294967168  ;;  %v230_v0 = vld [vmem:[%s193_s11] sm:$0xff]  ;;  %p224_p11 = scmp.lt.s32.totalorder %s636_s19, 1  ;;  %vm280_vm0 = vcmask 0   ;;  %v587_v12 = vmov 0   ;;  %v588_v13 = vmov 1  }
  0x38   : > { %231 = vadd.xlane.f32.xlu0 %v230_v0  ;;  %481 = vset.pattern.permute.xlu1 %v587_v12  ;;  %v265_v29 = vld [vmem:[%s798_s1] sm:$0xff]  ;;  %s426_s5 = sshll.u32 %s636_s19, 7  ;;  %s213_s6 = scalar_lea.vmem [#allocation5], %s423_s9 }
  0x39   : > { %s732_s8 = scalar_select %p224_p11, %s636_s19, 1  ;;  %483 = vset.pattern.permute.xlu0 %v588_v13 }
  0x3a   : > { %s303_s13 = sshll.u32 %s213_s6, 4  ;;  %s284_s12 = scalar_lea.sflag [#allocation4], %s720_s7  ;;  %s755_s13 = int_to_ptr.vmem [resolvable:$true] %s303_s13 }
  0x3b   : > { %s226_s14 = scalar_lea.vmem %s800_s3, %s732_s8  ;;  %s229_s25 = scalar_lea.vmem %s801_s4, %s732_s8 }
  0x3c   : > { %s518_s26 = scalar_lea.vmem %s755_s13, 128  ;;  %p810_p12 = scmp.ne.s32.totalorder %s805_s27, 0 }
  0x3d   : > { %p519_p6 = scmp.ne.s32.totalorder %s755_s13, %s518_s26  ;;  %s589_s19 = smov [#allocation5]  }
  0x3e   : > { %s522_s9 = sshll.u32 %s589_s19, 4  ;;  %s523_s9 = int_to_ptr.vmem [resolvable:$false] %s522_s9 }
  0x3f   : > { %p520_p13 = pnand %p519_p6, %p810_p12  ;;  %p525_p10 = scmp.lt.s32.totalorder %s755_s13, %s523_s9 }
  0x41   : > { %p521_p7 = pneg %p520_p13 }
  0xc5   : > { %v232_v1 = vpop.xlane.xlu0 %231 }
  0xc6   : > { %v233_v2 = vrot.slane %v232_v1, 4 }
  0xc8   : > { %v234_v3 = vadd.f32 %v233_v2, %v232_v1 }
  0xca   : > { %v235_v4 = vrot.slane %v234_v3, 2 }
  0xcc   : > { %v236_v5 = vadd.f32 %v235_v4, %v234_v3 }
  0xce   : > { %v237_v6 = vrot.slane %v236_v5, 1 }
  0xd0   : > { %v238_v7 = vadd.f32 %v237_v6, %v236_v5 }
  0xd2   : > { %429 = vpush %v238_v7 }
 0x103   : > { %s430_s10 = spop %429 }
 0x104   : > { %v240_v8 = vstv %s430_s10  ;;  %s753_s10 = scalar_lea.hbm %s799_s2, %s426_s5 }
 0x105   : > { %v241_v9 = vmul.f32 0.0009765625, %v240_v8 }
 0x107   : > { %v242_v10 = vsub.f32 %v230_v0, %v241_v9  ;;  %281 = vst.msk [vmem:[%s226_s14] sm:$0x1] %vm280_vm0, %v241_v9  ;;  %s524_s14 = scalar_lea.vmem %s523_s9, 256 }
 0x108   : > { %p526_p2 = scmp.lt.s32.totalorder %s524_s14, %s518_s26 }
 0x109   : > { %v243_v11 = vmul.f32 %v242_v10, %v242_v10 }
 0x10a   : > { %p527_p4 = por %p526_p2, %p525_p10 }
 0x10b   : > { %244 = vadd.xlane.f32.xlu0 %v243_v11 }
 0x10c   : > { %p528_p5 = pnand %p527_p4, %p521_p7 }
 0x198   : > { %v245_v14 = vpop.xlane.xlu0 %244 }
 0x199   : > { %v246_v15 = vrot.slane %v245_v14, 4 }
 0x19b   : > { %v247_v16 = vadd.f32 %v246_v15, %v245_v14 }
 0x19d   : > { %v248_v17 = vrot.slane %v247_v16, 2 }
 0x19f   : > { %v249_v18 = vadd.f32 %v248_v17, %v247_v16 }
 0x1a1   : > { %v250_v19 = vrot.slane %v249_v18, 1 }
 0x1a3   : > { %v251_v20 = vadd.f32 %v250_v19, %v249_v18 }
 0x1a5   : > { %431 = vpush %v251_v20 }
 0x1d6   : > { %s432_s20 = spop %431 }
 0x1d7   : > { %v253_v21 = vstv %s432_s20 }
 0x1d8   : > { %v254_v22 = vmul.f32 0.0009765625, %v253_v21 }
 0x1da   : > { %v255_v23 = vadd.f32 1e-05, %v254_v22 }
 0x1dc   : > { %484 = vrsqrt.f32 %v255_v23  ;;  %vm258_vm1 = vcmp.eq.f32.partialorder %v255_v23, inf  ;;  %v261_v26 = vand.u32 2147483648, %v255_v23  ;;  %vm260_vm2 = vcmp.eq.f32.partialorder %v255_v23, 0.0 }
 0x1e6   : > { %v485_v24 = vpop.eup %484 }
 0x1e7   : > { %v257_v25 = vmul.f32 %v485_v24, %v255_v23 }
 0x1e9   : > { %v259_v27 = vsel %vm258_vm1, %v255_v23, %v257_v25 }
 0x1ea   : > { %v262_v28 = vsel %vm260_vm2, %v261_v26, %v259_v27 }
 0x1eb   : > { %486 = vrcp.f32 %v262_v28  ;;  %282 = vst.msk [vmem:[%s229_s25] sm:$0x1] %vm280_vm0, %v262_v28 }
 0x1f5   : > { %v487_v30 = vpop.eup %486 }
 0x1f6   : > { %v266_v31 = vmul.f32 %v487_v30, %v265_v29 }
 0x1f8   : > { %269 = vperm.xlu1 %481, %v266_v31  }
 0x1fc   : > { %482 = vset.pattern.permute.xlu1 %v588_v13 }
 0x1fd   : > { %275 = vperm.xlu1 %482, %v265_v29  }
 0x277   : > { %v270_v32 = vpop.permute.xlu1 %269 }
 0x278   : > { %v272_v33 = vmul.f32 %v270_v32, %v242_v10 }
 0x27c   : > { %v276_v34 = vpop.permute.xlu1 %275 }
 0x27d   : > { %v278_v35 = vadd.f32 %v276_v34, %v272_v33 }
 0x27f   : > { %279 = vst [vmem:[%s213_s6] sm:$0xff] %v278_v35 }
 0x280   : > { %531 = shalt.err (!%p528_p5)
}
 0x281   : > { %s532_s7 = scalar_lea.hbm %s753_s10, 128  ;;  %s536_s23 = scalar_lea.hbm %s799_s2, 256 }
 0x282   : > { %p533_p8 = scmp.ne.s32.totalorder %s753_s10, %s532_s7  ;;  %p537_p1 = scmp.lt.u32.totalorder %s753_s10, %s799_s2 }
 0x283   : > { %p538_p3 = scmp.lt.u32.totalorder %s536_s23, %s532_s7  ;;  %p540_p6 = scmp.lt.u32.totalorder %s532_s7, %s753_s10 }
 0x284   : > { %p534_p9 = pnand %p533_p8, %p810_p12 }
 0x285   : > { %p539_p11 = por %p538_p3, %p537_p1 }
 0x286   : > { %p535_p0 = pneg %p534_p9 }
 0x287   : > { %p541_p13 = por %p540_p6, %p539_p11 }
 0x289   : > { %p542_p7 = pnand %p541_p13, %p535_p0 }
 0x28b   : > { %545 = shalt.err (!%p542_p7)
}
 0x28c   : > { %435 = dma.vmem_to_hbm [thread:$0]  (%p810_p12), %s755_s13, 128, %s753_s10, %s284_s12  }
 0x28d PF: > { %s321_s30 = sand.u32 1, %s572_s15   ;;  %p811_p10 = scmp.ne.s32.totalorder %s806_s28, 0 }
 0x28e   : > { %p812_p2 = scmp.ge.s32.totalorder %s584_s18, 2  ;;  %s322_s5 = scalar_lea.sflag [#allocation4], %s321_s30 }
 0x290   : > { %p442_p4 = pnand %p812_p2, %p811_p10 }
 0x292   : > { %567 = dma.done.wait (!%p442_p4), %s322_s5, 128  }
 0x293   : > { %569 = vsyncadd (!%p442_p4), %s322_s5, 4294967168  ;;  %p18_p5 = scmp.ge.s32.totalorder %s640_s21, 4   ;;  %s813_s15 = smov %s576_s16 }
 0x294   : > { %s814_s16 = smov %s580_s17  ;;  %s815_s17 = smov %s652_s24 }
 0x295   : > { %s816_s18 = smov %s640_s21  ;;  %20 = sbr.rel (!%p18_p5) target bundleno = 5 (0x5), region = 97 }
 0x29c   :  { %339 = vsyncpa [#allocation3], 1 }
 0x29d   :  { %341 = vsyncpa [#allocation3 + $0x1], 1 }
 0x29e   :  { %342 = vsyncpa [#allocation4], 1 }
 0x29f   :  { %344 = vsyncpa [#allocation4 + $0x1], 1 }

</bundles_post_ra>
